<compile_context>
chip_gen: v5e
topology: v5e:2x2
jax: 0.10.0
libtpu: 0.0.40
codegen_flags: <defaults>
</compile_context>

<pallas_src>
import functools

import jax
import jax.numpy as jnp
from jax.experimental import pallas as pl
from jax.experimental.pallas import tpu as pltpu


# ----------------------------------------------------------------------------
# Shared 1-D bilinear setup (Caffe2 bilinear_interpolate semantics).
# ----------------------------------------------------------------------------
def _bilinear_1d(coord, size):
    """Returns (low_idx, high_idx, frac, valid) for Caffe2-style bilinear."""
    valid = (coord >= -1.0) & (coord <= size)
    c = jnp.maximum(coord, 0.0)
    low = jnp.floor(c)
    at_edge = low >= size - 1
    low = jnp.where(at_edge, size - 1.0, low)
    high = jnp.where(at_edge, size - 1.0, low + 1.0)
    c = jnp.where(at_edge, low, c)
    frac = c - low
    return low.astype(jnp.int32), high.astype(jnp.int32), frac, valid


# ----------------------------------------------------------------------------
# Glue: separable 1-D interpolation-weight factors (function of boxes only).
#   w[r, p, i] = (1/sr) * sum_s valid(coord) * bilinear_weight(coord(r,p,s), i)
# so that  Wy @ feat @ Wx^T  reproduces the sub-sample-averaged bilinear crop.
# ----------------------------------------------------------------------------
def _axis_weights(start, bin_sz, pooled, size, sr):
    f32 = jnp.float32
    grid = jnp.arange(pooled, dtype=f32)[None, :, None]              # (1,P,1)
    sub = (jnp.arange(sr, dtype=f32) + 0.5)[None, None, :]           # (1,1,sr)
    b = bin_sz[:, None, None]
    coords = start[:, None, None] + grid * b + sub * b / sr          # (R,P,sr)
    lo, hi, frac, valid = _bilinear_1d(coords, size)
    vscale = valid.astype(f32) / sr
    w_lo = (1.0 - frac) * vscale
    w_hi = frac * vscale
    idx = jnp.arange(size, dtype=jnp.int32)
    oh_lo = (lo[..., None] == idx).astype(f32)                       # (R,P,sr,size)
    oh_hi = (hi[..., None] == idx).astype(f32)
    return (w_lo[..., None] * oh_lo + w_hi[..., None] * oh_hi).sum(axis=2)


def _build_separable_weights(rois, *, H, W, pooled_h, pooled_w,
                             spatial_scale, sampling_ratio):
    sr = int(sampling_ratio)
    sw = rois[:, 1] * spatial_scale
    sh = rois[:, 2] * spatial_scale
    ew = rois[:, 3] * spatial_scale
    eh = rois[:, 4] * spatial_scale
    rw = jnp.maximum(ew - sw, 1.0)
    rh = jnp.maximum(eh - sh, 1.0)
    wy = _axis_weights(sh, rh / pooled_h, pooled_h, H, sr)           # (R,PH,H)
    wx = _axis_weights(sw, rw / pooled_w, pooled_w, W, sr)           # (R,PW,W)
    return wy, wx


# ----------------------------------------------------------------------------
# Pallas kernel: per ROI, two chained MXU contractions + fused 2x2/s1 max pool.
# ----------------------------------------------------------------------------
def _roi_align_max_kernel(bidx_ref, wy_ref, wx_ref, f_ref, o_ref,
                          *, PH, PW, W, Cp):
    # bidx_ref (scalar prefetch) is consumed by the feature index_map only.
    del bidx_ref
    # Step 1 (MXU): contract H over the whole feature slab.
    #   (PH, H) @ (H, W*Cp) -> (PH, W*Cp)
    t = jnp.dot(wy_ref[...], f_ref[...], preferred_element_type=jnp.float32)
    t3 = t.reshape(PH, W, Cp)
    wx = wx_ref[...].astype(jnp.float32)                             # (PW, W)
    # Step 2 (MXU, static unroll over PH): contract W.
    rows = [jnp.dot(wx, t3[ph], preferred_element_type=jnp.float32)
            for ph in range(PH)]                                     # PH x (PW,Cp)
    # Fused 2x2 stride-1 max pool; column PW-1 of every output row is dead
    # padding kept so the store is a single aligned full-block write.
    out_rows = []
    for ah in range(PH - 1):
        m = jnp.maximum(rows[ah], rows[ah + 1])                      # (PW, Cp)
        shifted = jnp.concatenate([m[1:], m[-1:]], axis=0)           # (PW, Cp)
        out_rows.append(jnp.maximum(m, shifted))
    o_ref[...] = jnp.concatenate(out_rows, axis=0).astype(o_ref.dtype)


def roi_align_max(features, rois, *, aligned_height, aligned_width,
                  spatial_scale, sampling_ratio, compute_dtype=jnp.float32):
    """features: (N, C, H, W) f32, rois: (R, 5) -> (R, C, aligned_h, aligned_w)."""
    features = features.astype(jnp.float32)
    rois = rois.astype(jnp.float32)
    N, C, H, W = features.shape
    R = rois.shape[0]
    PH, PW = aligned_height + 1, aligned_width + 1
    AH, AW = aligned_height, aligned_width

    # Sort ROIs by batch index so consecutive grid steps hit the same feature
    # block index (Pallas skips the HBM->VMEM DMA when it repeats).
    bidx_all = rois[:, 0].astype(jnp.int32)
    order = jnp.argsort(bidx_all)
    rois_s = rois[order]
    bidx = bidx_all[order]

    # Separable bilinear weight factors (glue, boxes only).
    wy, wx = _build_separable_weights(
        rois_s, H=H, W=W, pooled_h=PH, pooled_w=PW,
        spatial_scale=spatial_scale, sampling_ratio=sampling_ratio)
    wy = wy.astype(compute_dtype)
    wx = wx.astype(compute_dtype)

    # Feature slab per image as (H, W*Cp): channels zero-padded to 128 lanes so
    # the matmul RHS and the output stores are lane-dense.
    Cp = ((C + 127) // 128) * 128
    feat = jnp.transpose(features, (0, 2, 3, 1))                     # (N,H,W,C)
    feat = jnp.pad(feat, ((0, 0), (0, 0), (0, 0), (0, Cp - C)))
    feat = feat.reshape(N, H, W * Cp).astype(compute_dtype)

    # VMEM limit derived from the actual double-buffered block sizes, clamped
    # to the device's capacity (v7x: 64 MiB per TC; v5e/v6e: 128 MiB).
    dsize = jnp.dtype(compute_dtype).itemsize
    need = 2 * dsize * (PH * H + PW * W + H * W * Cp) + 2 * 4 * (AH * PW * Cp)
    vmem_limit = max(int(need) + (8 << 20), 16 << 20)
    try:
        cap = int(pltpu.get_tpu_info().vmem_capacity_bytes)
    except Exception:
        cap = 64 << 20
    vmem_limit = min(vmem_limit, max(cap - (8 << 20), 16 << 20))

    kernel = functools.partial(_roi_align_max_kernel, PH=PH, PW=PW, W=W, Cp=Cp)
    out = pl.pallas_call(
        kernel,
        out_shape=jax.ShapeDtypeStruct((R, AH * PW, Cp), jnp.float32),
        grid_spec=pltpu.PrefetchScalarGridSpec(
            num_scalar_prefetch=1,
            grid=(R,),
            in_specs=[
                # per-ROI row / column interpolation factors
                pl.BlockSpec((None, PH, H), lambda r, b: (r, 0, 0)),
                pl.BlockSpec((None, PW, W), lambda r, b: (r, 0, 0)),
                # feature slab of this ROI's batch element (data-dependent index)
                pl.BlockSpec((None, H, W * Cp), lambda r, b: (b[r], 0, 0)),
            ],
            out_specs=pl.BlockSpec((None, AH * PW, Cp), lambda r, b: (r, 0, 0)),
        ),
        compiler_params=pltpu.CompilerParams(
            dimension_semantics=("parallel",),
            vmem_limit_bytes=vmem_limit,
        ),
    )(bidx, wy, wx, feat)

    # Strip padding (dead column per pooled row, channel pad) and restore the
    # original ROI order and NCHW layout.
    out = out.reshape(R, AH, PW, Cp)[:, :, :AW, :C]                  # (R,AH,AW,C)
    out = jnp.transpose(out, (0, 3, 1, 2))                           # (R,C,AH,AW)
    inv = jnp.argsort(order)
    return out[inv]


# ----------------------------------------------------------------------------
# Plain-JAX reference (direct gather formulation) for correctness checking.
# ----------------------------------------------------------------------------
def roi_align_max_reference(features, rois, *, aligned_height, aligned_width,
                            spatial_scale, sampling_ratio):
    N, C, H, W = features.shape
    PH, PW = aligned_height + 1, aligned_width + 1
    sr = int(sampling_ratio)
    f32 = jnp.float32

    def one(roi):
        b = roi[0].astype(jnp.int32)
        img = features[b]                                        # (C, H, W)
        sw, sh = roi[1] * spatial_scale, roi[2] * spatial_scale
        ew, eh = roi[3] * spatial_scale, roi[4] * spatial_scale
        rw = jnp.maximum(ew - sw, 1.0)
        rh = jnp.maximum(eh - sh, 1.0)
        bh, bw = rh / PH, rw / PW
        ys = (sh + jnp.arange(PH, dtype=f32)[:, None] * bh
              + (jnp.arange(sr, dtype=f32)[None, :] + 0.5) * bh / sr)   # (PH,sr)
        xs = (sw + jnp.arange(PW, dtype=f32)[:, None] * bw
              + (jnp.arange(sr, dtype=f32)[None, :] + 0.5) * bw / sr)   # (PW,sr)
        y0, y1, ly, yv = _bilinear_1d(ys.reshape(-1), H)         # (PH*sr,)
        x0, x1, lx, xv = _bilinear_1d(xs.reshape(-1), W)         # (PW*sr,)
        hy, hx = 1.0 - ly, 1.0 - lx

        def g(yi, xi):
            return img[:, yi[:, None], xi[None, :]]              # (C,PH*sr,PW*sr)

        val = (hy[:, None] * hx[None, :] * g(y0, x0)
               + hy[:, None] * lx[None, :] * g(y0, x1)
               + ly[:, None] * hx[None, :] * g(y1, x0)
               + ly[:, None] * lx[None, :] * g(y1, x1))
        val = jnp.where(yv[:, None] & xv[None, :], val, 0.0)
        val = val.reshape(C, PH, sr, PW, sr).mean(axis=(2, 4))   # (C, PH, PW)
        return jnp.maximum(
            jnp.maximum(val[:, :-1, :-1], val[:, :-1, 1:]),
            jnp.maximum(val[:, 1:, :-1], val[:, 1:, 1:]))        # (C, AH, AW)

    return jax.vmap(one)(rois)


if __name__ == "__main__":
    key = jax.random.PRNGKey(0)
    k_feat, k_roi = jax.random.split(key, 2)

    # Small shapes: batch=2, channels=4, feature map 16x16 (image coords 64x64).
    N_img, C, H, W = 2, 4, 16, 16
    aligned_h, aligned_w = 7, 7
    spatial_scale = 0.25
    sampling_ratio = 2
    R = 6

    feat = jax.random.normal(k_feat, (N_img, C, H, W), dtype=jnp.float32)

    # rois: [batch_idx, x1, y1, x2, y2] in image coordinates (alternating batch
    # indices exercise the batch-sort + output un-permutation path).
    ru = jax.random.uniform(k_roi, (R, 4), minval=0.0, maxval=1.0)
    batch_idx = jnp.array([0, 1, 0, 1, 0, 1], dtype=jnp.float32)[:, None]
    x1 = ru[:, 0:1] * 40.0
    y1 = ru[:, 1:2] * 40.0
    x2 = x1 + 8.0 + ru[:, 2:3] * 16.0
    y2 = y1 + 8.0 + ru[:, 3:4] * 16.0
    rois = jnp.concatenate([batch_idx, x1, y1, x2, y2], axis=1)

    fwd = jax.jit(functools.partial(
        roi_align_max,
        aligned_height=aligned_h, aligned_width=aligned_w,
        spatial_scale=spatial_scale, sampling_ratio=sampling_ratio))

    out = jax.block_until_ready(fwd(feat, rois))

    ref = roi_align_max_reference(
        feat, rois,
        aligned_height=aligned_h, aligned_width=aligned_w,
        spatial_scale=spatial_scale, sampling_ratio=sampling_ratio)

    assert out.shape == (R, C, aligned_h, aligned_w), out.shape
    assert jnp.allclose(out, ref, rtol=1e-4, atol=1e-4), "mismatch vs reference"

    print("KERNEL_OK")
</pallas_src>

<mosaic_0001>
module attributes {stable_mosaic.version = 11 : i64} {
  func.func @_roi_align_max_kernel(%arg0: i32, %arg1: memref<6xi32, #tpu.memory_space<smem>>, %arg2: memref<1x8x16xf32, #tpu.memory_space<vmem>>, %arg3: memref<1x8x16xf32, #tpu.memory_space<vmem>>, %arg4: memref<1x16x2048xf32, #tpu.memory_space<vmem>>, %arg5: memref<1x56x128xf32, #tpu.memory_space<vmem>>) attributes {dimension_semantics = [#tpu.dimension_semantics<parallel>], iteration_bounds = array<i64: 6>, scalar_prefetch = 1 : i64, scratch_operands = 0 : i64, tpu.core_type = #tpu.core_type<tc>, window_params = [{transform_indices = @transform_0, window_bounds = array<i64: 1, 8, 16>}, {transform_indices = @transform_1, window_bounds = array<i64: 1, 8, 16>}, {transform_indices = @transform_2, window_bounds = array<i64: 1, 16, 2048>}, {transform_indices = @transform_3, window_bounds = array<i64: 1, 56, 128>}]} {
    %c0 = arith.constant 0 : index
    %c0_0 = arith.constant 0 : index
    %c0_1 = arith.constant 0 : index
    %0 = vector.load %arg2[%c0, %c0_0, %c0_1] : memref<1x8x16xf32, #tpu.memory_space<vmem>>, vector<1x8x16xf32>
    %1 = vector.shape_cast %0 : vector<1x8x16xf32> to vector<8x16xf32>
    %c0_2 = arith.constant 0 : index
    %c0_3 = arith.constant 0 : index
    %c0_4 = arith.constant 0 : index
    %2 = vector.load %arg4[%c0_2, %c0_3, %c0_4] : memref<1x16x2048xf32, #tpu.memory_space<vmem>>, vector<1x16x2048xf32>
    %3 = vector.shape_cast %2 : vector<1x16x2048xf32> to vector<16x2048xf32>
    %cst = arith.constant dense<0.000000e+00> : vector<8x2048xf32>
    %4 = tpu.matmul %1, %3, %cst {dimension_numbers = #tpu.dot_dimension_numbers<[1], [0], [0], [1], [0, 0, 1, 1], [], []>} : vector<8x16xf32>, vector<16x2048xf32>, vector<8x2048xf32> -> vector<8x2048xf32>
    %5 = vector.shape_cast %4 : vector<8x2048xf32> to vector<8x16x128xf32>
    %c0_5 = arith.constant 0 : index
    %c0_6 = arith.constant 0 : index
    %c0_7 = arith.constant 0 : index
    %6 = vector.load %arg3[%c0_5, %c0_6, %c0_7] : memref<1x8x16xf32, #tpu.memory_space<vmem>>, vector<1x8x16xf32>
    %7 = vector.shape_cast %6 : vector<1x8x16xf32> to vector<8x16xf32>
    %8 = vector.extract_strided_slice %5 {offsets = [0, 0, 0], sizes = [1, 16, 128], strides = [1, 1, 1]} : vector<8x16x128xf32> to vector<1x16x128xf32>
    %9 = vector.shape_cast %8 : vector<1x16x128xf32> to vector<16x128xf32>
    %cst_8 = arith.constant dense<0.000000e+00> : vector<8x128xf32>
    %10 = tpu.matmul %7, %9, %cst_8 {dimension_numbers = #tpu.dot_dimension_numbers<[1], [0], [0], [1], [0, 0, 1, 1], [], []>} : vector<8x16xf32>, vector<16x128xf32>, vector<8x128xf32> -> vector<8x128xf32>
    %11 = vector.extract_strided_slice %5 {offsets = [1, 0, 0], sizes = [1, 16, 128], strides = [1, 1, 1]} : vector<8x16x128xf32> to vector<1x16x128xf32>
    %12 = vector.shape_cast %11 : vector<1x16x128xf32> to vector<16x128xf32>
    %cst_9 = arith.constant dense<0.000000e+00> : vector<8x128xf32>
    %13 = tpu.matmul %7, %12, %cst_9 {dimension_numbers = #tpu.dot_dimension_numbers<[1], [0], [0], [1], [0, 0, 1, 1], [], []>} : vector<8x16xf32>, vector<16x128xf32>, vector<8x128xf32> -> vector<8x128xf32>
    %14 = vector.extract_strided_slice %5 {offsets = [2, 0, 0], sizes = [1, 16, 128], strides = [1, 1, 1]} : vector<8x16x128xf32> to vector<1x16x128xf32>
    %15 = vector.shape_cast %14 : vector<1x16x128xf32> to vector<16x128xf32>
    %cst_10 = arith.constant dense<0.000000e+00> : vector<8x128xf32>
    %16 = tpu.matmul %7, %15, %cst_10 {dimension_numbers = #tpu.dot_dimension_numbers<[1], [0], [0], [1], [0, 0, 1, 1], [], []>} : vector<8x16xf32>, vector<16x128xf32>, vector<8x128xf32> -> vector<8x128xf32>
    %17 = vector.extract_strided_slice %5 {offsets = [3, 0, 0], sizes = [1, 16, 128], strides = [1, 1, 1]} : vector<8x16x128xf32> to vector<1x16x128xf32>
    %18 = vector.shape_cast %17 : vector<1x16x128xf32> to vector<16x128xf32>
    %cst_11 = arith.constant dense<0.000000e+00> : vector<8x128xf32>
    %19 = tpu.matmul %7, %18, %cst_11 {dimension_numbers = #tpu.dot_dimension_numbers<[1], [0], [0], [1], [0, 0, 1, 1], [], []>} : vector<8x16xf32>, vector<16x128xf32>, vector<8x128xf32> -> vector<8x128xf32>
    %20 = vector.extract_strided_slice %5 {offsets = [4, 0, 0], sizes = [1, 16, 128], strides = [1, 1, 1]} : vector<8x16x128xf32> to vector<1x16x128xf32>
    %21 = vector.shape_cast %20 : vector<1x16x128xf32> to vector<16x128xf32>
    %cst_12 = arith.constant dense<0.000000e+00> : vector<8x128xf32>
    %22 = tpu.matmul %7, %21, %cst_12 {dimension_numbers = #tpu.dot_dimension_numbers<[1], [0], [0], [1], [0, 0, 1, 1], [], []>} : vector<8x16xf32>, vector<16x128xf32>, vector<8x128xf32> -> vector<8x128xf32>
    %23 = vector.extract_strided_slice %5 {offsets = [5, 0, 0], sizes = [1, 16, 128], strides = [1, 1, 1]} : vector<8x16x128xf32> to vector<1x16x128xf32>
    %24 = vector.shape_cast %23 : vector<1x16x128xf32> to vector<16x128xf32>
    %cst_13 = arith.constant dense<0.000000e+00> : vector<8x128xf32>
    %25 = tpu.matmul %7, %24, %cst_13 {dimension_numbers = #tpu.dot_dimension_numbers<[1], [0], [0], [1], [0, 0, 1, 1], [], []>} : vector<8x16xf32>, vector<16x128xf32>, vector<8x128xf32> -> vector<8x128xf32>
    %26 = vector.extract_strided_slice %5 {offsets = [6, 0, 0], sizes = [1, 16, 128], strides = [1, 1, 1]} : vector<8x16x128xf32> to vector<1x16x128xf32>
    %27 = vector.shape_cast %26 : vector<1x16x128xf32> to vector<16x128xf32>
    %cst_14 = arith.constant dense<0.000000e+00> : vector<8x128xf32>
    %28 = tpu.matmul %7, %27, %cst_14 {dimension_numbers = #tpu.dot_dimension_numbers<[1], [0], [0], [1], [0, 0, 1, 1], [], []>} : vector<8x16xf32>, vector<16x128xf32>, vector<8x128xf32> -> vector<8x128xf32>
    %29 = vector.extract_strided_slice %5 {offsets = [7, 0, 0], sizes = [1, 16, 128], strides = [1, 1, 1]} : vector<8x16x128xf32> to vector<1x16x128xf32>
    %30 = vector.shape_cast %29 : vector<1x16x128xf32> to vector<16x128xf32>
    %cst_15 = arith.constant dense<0.000000e+00> : vector<8x128xf32>
    %31 = tpu.matmul %7, %30, %cst_15 {dimension_numbers = #tpu.dot_dimension_numbers<[1], [0], [0], [1], [0, 0, 1, 1], [], []>} : vector<8x16xf32>, vector<16x128xf32>, vector<8x128xf32> -> vector<8x128xf32>
    %32 = arith.maximumf %10, %13 : vector<8x128xf32>
    %33 = vector.extract_strided_slice %32 {offsets = [1, 0], sizes = [7, 128], strides = [1, 1]} : vector<8x128xf32> to vector<7x128xf32>
    %34 = vector.extract_strided_slice %32 {offsets = [7, 0], sizes = [1, 128], strides = [1, 1]} : vector<8x128xf32> to vector<1x128xf32>
    %35 = tpu.concatenate %33, %34 in 0 : vector<7x128xf32>, vector<1x128xf32> -> vector<8x128xf32>
    %36 = arith.maximumf %32, %35 : vector<8x128xf32>
    %37 = arith.maximumf %13, %16 : vector<8x128xf32>
    %38 = vector.extract_strided_slice %37 {offsets = [1, 0], sizes = [7, 128], strides = [1, 1]} : vector<8x128xf32> to vector<7x128xf32>
    %39 = vector.extract_strided_slice %37 {offsets = [7, 0], sizes = [1, 128], strides = [1, 1]} : vector<8x128xf32> to vector<1x128xf32>
    %40 = tpu.concatenate %38, %39 in 0 : vector<7x128xf32>, vector<1x128xf32> -> vector<8x128xf32>
    %41 = arith.maximumf %37, %40 : vector<8x128xf32>
    %42 = arith.maximumf %16, %19 : vector<8x128xf32>
    %43 = vector.extract_strided_slice %42 {offsets = [1, 0], sizes = [7, 128], strides = [1, 1]} : vector<8x128xf32> to vector<7x128xf32>
    %44 = vector.extract_strided_slice %42 {offsets = [7, 0], sizes = [1, 128], strides = [1, 1]} : vector<8x128xf32> to vector<1x128xf32>
    %45 = tpu.concatenate %43, %44 in 0 : vector<7x128xf32>, vector<1x128xf32> -> vector<8x128xf32>
    %46 = arith.maximumf %42, %45 : vector<8x128xf32>
    %47 = arith.maximumf %19, %22 : vector<8x128xf32>
    %48 = vector.extract_strided_slice %47 {offsets = [1, 0], sizes = [7, 128], strides = [1, 1]} : vector<8x128xf32> to vector<7x128xf32>
    %49 = vector.extract_strided_slice %47 {offsets = [7, 0], sizes = [1, 128], strides = [1, 1]} : vector<8x128xf32> to vector<1x128xf32>
    %50 = tpu.concatenate %48, %49 in 0 : vector<7x128xf32>, vector<1x128xf32> -> vector<8x128xf32>
    %51 = arith.maximumf %47, %50 : vector<8x128xf32>
    %52 = arith.maximumf %22, %25 : vector<8x128xf32>
    %53 = vector.extract_strided_slice %52 {offsets = [1, 0], sizes = [7, 128], strides = [1, 1]} : vector<8x128xf32> to vector<7x128xf32>
    %54 = vector.extract_strided_slice %52 {offsets = [7, 0], sizes = [1, 128], strides = [1, 1]} : vector<8x128xf32> to vector<1x128xf32>
    %55 = tpu.concatenate %53, %54 in 0 : vector<7x128xf32>, vector<1x128xf32> -> vector<8x128xf32>
    %56 = arith.maximumf %52, %55 : vector<8x128xf32>
    %57 = arith.maximumf %25, %28 : vector<8x128xf32>
    %58 = vector.extract_strided_slice %57 {offsets = [1, 0], sizes = [7, 128], strides = [1, 1]} : vector<8x128xf32> to vector<7x128xf32>
    %59 = vector.extract_strided_slice %57 {offsets = [7, 0], sizes = [1, 128], strides = [1, 1]} : vector<8x128xf32> to vector<1x128xf32>
    %60 = tpu.concatenate %58, %59 in 0 : vector<7x128xf32>, vector<1x128xf32> -> vector<8x128xf32>
    %61 = arith.maximumf %57, %60 : vector<8x128xf32>
    %62 = arith.maximumf %28, %31 : vector<8x128xf32>
    %63 = vector.extract_strided_slice %62 {offsets = [1, 0], sizes = [7, 128], strides = [1, 1]} : vector<8x128xf32> to vector<7x128xf32>
    %64 = vector.extract_strided_slice %62 {offsets = [7, 0], sizes = [1, 128], strides = [1, 1]} : vector<8x128xf32> to vector<1x128xf32>
    %65 = tpu.concatenate %63, %64 in 0 : vector<7x128xf32>, vector<1x128xf32> -> vector<8x128xf32>
    %66 = arith.maximumf %62, %65 : vector<8x128xf32>
    %67 = tpu.concatenate %36, %41, %46, %51, %56, %61, %66 in 0 : vector<8x128xf32>, vector<8x128xf32>, vector<8x128xf32>, vector<8x128xf32>, vector<8x128xf32>, vector<8x128xf32>, vector<8x128xf32> -> vector<56x128xf32>
    %c0_16 = arith.constant 0 : index
    %c0_17 = arith.constant 0 : index
    %c0_18 = arith.constant 0 : index
    %68 = vector.load %arg5[%c0_16, %c0_17, %c0_18] : memref<1x56x128xf32, #tpu.memory_space<vmem>>, vector<1x56x128xf32>
    %69 = vector.shape_cast %68 : vector<1x56x128xf32> to vector<56x128xf32>
    %70 = vector.shape_cast %67 : vector<56x128xf32> to vector<1x56x128xf32>
    tpu.vector_store %arg5[%c0_16, %c0_17, %c0_18], %70 {strides = array<i32>} : memref<1x56x128xf32, #tpu.memory_space<vmem>>, vector<1x56x128xf32>,
    return
  }
  func.func @transform_0(%arg0: i32, %arg1: memref<6xi32, #tpu.memory_space<smem>>) -> (i32, i32, i32) {
    %c0_i32 = arith.constant 0 : i32
    %c0_i32_0 = arith.constant 0 : i32
    %c0_i32_1 = arith.constant 0 : i32
    return %arg0, %c0_i32, %c0_i32_0 : i32, i32, i32
  }
  func.func @transform_1(%arg0: i32, %arg1: memref<6xi32, #tpu.memory_space<smem>>) -> (i32, i32, i32) {
    %c0_i32 = arith.constant 0 : i32
    %c0_i32_0 = arith.constant 0 : i32
    %c0_i32_1 = arith.constant 0 : i32
    return %arg0, %c0_i32, %c0_i32_0 : i32, i32, i32
  }
  func.func @transform_2(%arg0: i32, %arg1: memref<6xi32, #tpu.memory_space<smem>>) -> (i32, i32, i32) {
    %0 = arith.index_cast %arg0 : i32 to index
    %1 = memref.load %arg1[%0] : memref<6xi32, #tpu.memory_space<smem>>
    %c0_i32 = arith.constant 0 : i32
    %c0_i32_0 = arith.constant 0 : i32
    %c0_i32_1 = arith.constant 0 : i32
    return %1, %c0_i32, %c0_i32_0 : i32, i32, i32
  }
  func.func @transform_3(%arg0: i32, %arg1: memref<6xi32, #tpu.memory_space<smem>>) -> (i32, i32, i32) {
    %c0_i32 = arith.constant 0 : i32
    %c0_i32_0 = arith.constant 0 : i32
    %c0_i32_1 = arith.constant 0 : i32
    return %arg0, %c0_i32, %c0_i32_0 : i32, i32, i32
  }
}

</mosaic_0001>

<bundles_post_ra>
// kernel: roi_align_max.1
= control target key start
LH: loop header
LB: loop body
LE: loop exit
PB: predicated region body
PF: predicated region fallthrough
CT: control target
= control target key end

     0   :  { %s1167_s18 = smov [#allocation3]   ;;  %s1421_s0 = inlined_call_operand.vmem [shape: s32[6], index: 0, kind: input, shape index: {}]   ;;  %s1422_s1 = inlined_call_operand.vmem [shape: f32[6,8,16], index: 1, kind: input, shape index: {}]   ;;  %s1423_s2 = inlined_call_operand.vmem [shape: f32[6,8,16], index: 2, kind: input, shape index: {}]   ;;  %s1424_s3 = inlined_call_operand.vmem [shape: f32[2,16,2048], index: 3, kind: input, shape index: {}]   ;;  %s1425_s4 = inlined_call_operand.vmem [shape: f32[6,56,128], index: 4, kind: output, shape index: {}]  }
   0x1   :  { %s10_s17 = sshll.u32 %s1421_s0, 4  ;;  %s11_s17 = int_to_ptr.vmem [resolvable:$true] %s10_s17 }
   0x2   :  { %13 = dma.vmem_to_smem %s11_s17, 16, %s1167_s18, [#allocation2] }
   0x3   :  { %1161 = dma.done.wait [#allocation2], 16 }
   0x4   :  { %1162 = vsyncadd [#allocation2], 4294967280 }
   0x5   :  { %16 = sfence }
   0x6   :  { %s1198_s19 = smov 0  }
   0x7 LB: > { %s1096_s20 = sadd.s32 4294967295, %s1165_s19   ;;  %p1100_p0 = scmp.ge.s32.totalorder %s1165_s19, 1  ;;  %s1165_s19 = sphi %s1198_s19, %s22_s19  }
   0x8   : > { %p168_p1 = scmp.lt.s32.totalorder %s1165_s19, 7 }
   0xa   : > { %p169_p2 = pnand %p1100_p0, %p168_p1 }
   0xb   : > { %s209_s0 = sld [smem:[#allocation3 + %s1096_s20]] (!%p169_p2)  ;;  %p201_p3 = scmp.lt.s32.totalorder (!%p169_p2), %s1096_s20, 5 }
   0xc   : > { %172 = sbr.rel (%p169_p2) target bundleno = 350 (0x15e), region = 32 }
  0x11   : > { %s1427_s20 = smov (!%p201_p3, %s1096_s20), 5  ;;  %p210_p4 = scmp.lt.s32.totalorder %s209_s0, 1  ;;  %vm254_vm0 = vcmask 130048   ;;  %v1168_v36 = vmov 1983009808   ;;  %vm579_vm1 = vcmask 1047556  }
  0x12   : > { %s1101_s21 = sshll.u32 %s1427_s20, 3  ;;  %v584_v37 = vunpack.c.l.s4 %v1168_v36  ;;  %v1169_v59 = vmov 1934713408   ;;  %s1133_s6 = smul.u32 56, %s1427_s20  ;;  %vm971_vm2 = vcmask 1046528  }
  0x13   : > { %s204_s24 = scalar_lea.vmem %s1422_s1, %s1101_s21  ;;  %s1429_s0 = smov (!%p210_p4, %s209_s0), 1  ;;  %v632_v60 = vunpack.c.l.s4 %v1169_v59 }
  0x14   : > { %s1132_s25 = sshll.u32 %s1429_s0, 8  ;;  %v1219_v0 = vld [vmem:[%s204_s24] sm:$0xff]  ;;  %v1285_v43 = vunpack.c.0.s8 %v584_v37  ;;  %s208_s5 = scalar_lea.vmem %s1423_s2, %s1101_s21 }
  0x15   : > { %s1217_s28 = scalar_lea.vmem %s1424_s3, %s1132_s25  ;;  %s1402_s9 = scalar_lea.vmem %s1425_s4, %s1133_s6 }
  0x16   : > { %v240_v1 = vld [vmem:[%s1217_s28 + $0x90] sm:$0xff]  ;;  %v241_v2 = vld [vmem:[%s1217_s28 + $0x98] sm:$0xff]  ;;  %v238_v5 = vld [vmem:[%s1217_s28 + $0x80] sm:$0xff] }
  0x17   : > { %v224_v3 = vld [vmem:[%s1217_s28 + $0x10] sm:$0xff]  ;;  %312 = vmatpush.msra.mxu2 %v240_v1  ;;  %332 = vmatpush.msra.mxu3 %v241_v2  ;;  %v225_v4 = vld [vmem:[%s1217_s28 + $0x18] sm:$0xff]  ;;  %v239_v6 = vld [vmem:[%s1217_s28 + $0x88] sm:$0xff] }
  0x18   : > { %272 = vmatpush.msra.mxu0 %v238_v5  ;;  %292 = vmatpush.msra.mxu1 %v239_v6  ;;  %v222_v7 = vld [vmem:[%s1217_s28] sm:$0xff]  ;;  %v223_v8 = vld [vmem:[%s1217_s28 + $0x8] sm:$0xff]  ;;  %v244_v9 = vld [vmem:[%s1217_s28 + $0xb0] sm:$0xff] }
  0x19   : > { %313 = vmatpush.msra.mxu2 %v224_v3  ;;  %333 = vmatpush.msra.mxu3 %v225_v4  ;;  %v245_v10 = vld [vmem:[%s1217_s28 + $0xb8] sm:$0xff]  ;;  %v242_v11 = vld [vmem:[%s1217_s28 + $0xa0] sm:$0xff]  ;;  %v243_v12 = vld [vmem:[%s1217_s28 + $0xa8] sm:$0xff] }
  0x1a   : > { %1108 = vmatmul.msk.f32.vlgmr.msra.gmra.mxu2 %vm254_vm0, %v1219_v0  ;;  %1109 = vmatmul.msk.f32.vlgmr.msra.gmra.mxu3 %vm254_vm0, %v1219_v0  ;;  %v228_v13 = vld [vmem:[%s1217_s28 + $0x30] sm:$0xff]  ;;  %v229_v14 = vld [vmem:[%s1217_s28 + $0x38] sm:$0xff]  ;;  %v226_v15 = vld [vmem:[%s1217_s28 + $0x20] sm:$0xff] }
  0x1b   : > { %273 = vmatpush.msra.mxu0 %v222_v7  ;;  %293 = vmatpush.msra.mxu1 %v223_v8  ;;  %v227_v16 = vld [vmem:[%s1217_s28 + $0x28] sm:$0xff]  ;;  %v248_v17 = vld [vmem:[%s1217_s28 + $0xd0] sm:$0xff]  ;;  %v249_v18 = vld [vmem:[%s1217_s28 + $0xd8] sm:$0xff]  ;;  %v1297_v8 = vunpack.c.0.s8 %v632_v60 }
  0x1c   : > { %1106 = vmatmul.msk.f32.vlgmr.msra.gmra.mxu0 %vm254_vm0, %v1219_v0  ;;  %1107 = vmatmul.msk.f32.vlgmr.msra.gmra.mxu1 %vm254_vm0, %v1219_v0  ;;  %v232_v19 = vld [vmem:[%s1217_s28 + $0x50] sm:$0xff]  ;;  %v233_v20 = vld [vmem:[%s1217_s28 + $0x58] sm:$0xff]  ;;  %v246_v21 = vld [vmem:[%s1217_s28 + $0xc0] sm:$0xff] }
  0x1d   : > { %392 = vmatpush.msrb.mxu2 %v244_v9  ;;  %412 = vmatpush.msrb.mxu3 %v245_v10  ;;  %v247_v22 = vld [vmem:[%s1217_s28 + $0xc8] sm:$0xff]  ;;  %v252_v23 = vld [vmem:[%s1217_s28 + $0xf0] sm:$0xff]  ;;  %v253_v24 = vld [vmem:[%s1217_s28 + $0xf8] sm:$0xff] }
  0x1e   : > { %352 = vmatpush.msrb.mxu0 %v242_v11  ;;  %372 = vmatpush.msrb.mxu1 %v243_v12  ;;  %v230_v25 = vld [vmem:[%s1217_s28 + $0x40] sm:$0xff]  ;;  %v231_v26 = vld [vmem:[%s1217_s28 + $0x48] sm:$0xff]  ;;  %v236_v27 = vld [vmem:[%s1217_s28 + $0x70] sm:$0xff] }
  0x1f   : > { %393 = vmatpush.msrb.mxu2 %v228_v13  ;;  %413 = vmatpush.msrb.mxu3 %v229_v14  ;;  %v237_v28 = vld [vmem:[%s1217_s28 + $0x78] sm:$0xff]  ;;  %v250_v29 = vld [vmem:[%s1217_s28 + $0xe0] sm:$0xff]  ;;  %v251_v30 = vld [vmem:[%s1217_s28 + $0xe8] sm:$0xff] }
  0x20   : > { %353 = vmatpush.msrb.mxu0 %v226_v15  ;;  %373 = vmatpush.msrb.mxu1 %v227_v16  ;;  %v234_v31 = vld [vmem:[%s1217_s28 + $0x60] sm:$0xff]  ;;  %v235_v32 = vld [vmem:[%s1217_s28 + $0x68] sm:$0xff] }
  0x21   : > { %472 = vmatpush.msra.mxu2 %v248_v17  ;;  %492 = vmatpush.msra.mxu3 %v249_v18 }
  0x22   : > { %1112 = vmatmul.msk.f32.vlgmr.msrb.gmra.mxu2 %vm254_vm0, %v1219_v0  ;;  %1113 = vmatmul.msk.f32.vlgmr.msrb.gmra.mxu3 %vm254_vm0, %v1219_v0 }
  0x23   : > { %473 = vmatpush.msra.mxu2 %v232_v19  ;;  %493 = vmatpush.msra.mxu3 %v233_v20 }
  0x24   : > { %1110 = vmatmul.msk.f32.vlgmr.msrb.gmra.mxu0 %vm254_vm0, %v1219_v0  ;;  %1111 = vmatmul.msk.f32.vlgmr.msrb.gmra.mxu1 %vm254_vm0, %v1219_v0 }
  0x25   : > { %432 = vmatpush.msra.mxu0 %v246_v21  ;;  %452 = vmatpush.msra.mxu1 %v247_v22 }
  0x26   : > { %552 = vmatpush.msrb.mxu2 %v252_v23  ;;  %572 = vmatpush.msrb.mxu3 %v253_v24 }
  0x27   : > { %433 = vmatpush.msra.mxu0 %v230_v25  ;;  %453 = vmatpush.msra.mxu1 %v231_v26 }
  0x28   : > { %553 = vmatpush.msrb.mxu2 %v236_v27  ;;  %573 = vmatpush.msrb.mxu3 %v237_v28 }
  0x29   : > { %512 = vmatpush.msrb.mxu0 %v250_v29  ;;  %532 = vmatpush.msrb.mxu1 %v251_v30 }
  0x2a   : > { %1116 = vmatmul.msk.f32.vlgmr.msra.gmra.mxu2 %vm254_vm0, %v1219_v0  ;;  %1117 = vmatmul.msk.f32.vlgmr.msra.gmra.mxu3 %vm254_vm0, %v1219_v0 }
  0x2b   : > { %513 = vmatpush.msrb.mxu0 %v234_v31  ;;  %533 = vmatpush.msrb.mxu1 %v235_v32 }
  0x2c   : > { %1114 = vmatmul.msk.f32.vlgmr.msra.gmra.mxu0 %vm254_vm0, %v1219_v0  ;;  %1115 = vmatmul.msk.f32.vlgmr.msra.gmra.mxu1 %vm254_vm0, %v1219_v0 }
  0x32   : > { %1120 = vmatmul.msk.f32.vlgmr.msrb.gmra.mxu2 %vm254_vm0, %v1219_v0  ;;  %1121 = vmatmul.msk.f32.vlgmr.msrb.gmra.mxu3 %vm254_vm0, %v1219_v0 }
  0x34   : > { %1118 = vmatmul.msk.f32.vlgmr.msrb.gmra.mxu0 %vm254_vm0, %v1219_v0  ;;  %1119 = vmatmul.msk.f32.vlgmr.msrb.gmra.mxu1 %vm254_vm0, %v1219_v0 }
  0x99   : > { %v275_v33 = vpop.f32.mrf.mxu0  ;;  %v295_v34 = vpop.f32.mrf.mxu1 }
  0x9a   : > { %v581_v39 = vrot.slane %v275_v33, 4  ;;  %v593_v40 = vrot.slane %v295_v34, 4 }
  0x9d   : > { %v315_v35 = vpop.f32.mrf.mxu2  ;;  %v335_v38 = vpop.f32.mrf.mxu3 }
  0x9e   : > { %v591_v41 = vrot.slane %v335_v38, 4  ;;  %v578_v42 = vrot.slane %v315_v35, 4  ;;  %v582_v47 = vsel %vm579_vm1, %v315_v35, %v581_v39  ;;  %v594_v48 = vsel %vm579_vm1, %v335_v38, %v593_v40 }
  0x9f   : > { %v590_v51 = vperm.slane %v582_v47, %v1285_v43  ;;  %v602_v52 = vperm.slane %v594_v48, %v1285_v43 }
  0xa0   : > { %v592_v44 = vsel %vm579_vm1, %v591_v41, %v295_v34  ;;  %v580_v49 = vsel %vm579_vm1, %v578_v42, %v275_v33 }
  0xa1   : > { %v355_v45 = vpop.f32.mrf.mxu0  ;;  %v375_v46 = vpop.f32.mrf.mxu1  ;;  %v598_v50 = vperm.slane %v592_v44, %v1285_v43  ;;  %v586_v55 = vperm.slane %v580_v49, %v1285_v43  ;;  %v641_v61 = vrot.slane %v590_v51, 4  ;;  %v639_v62 = vrot.slane %v602_v52, 4 }
  0xa2   : > { %v605_v57 = vrot.slane %v355_v45, 4  ;;  %v617_v58 = vrot.slane %v375_v46, 4 }
  0xa3   : > { %v627_v56 = vrot.slane %v598_v50, 4  ;;  %v629_v5 = vrot.slane %v586_v55, 4  ;;  %v642_v10 = vsel %vm579_vm1, %v602_v52, %v641_v61  ;;  %v640_v15 = vsel %vm579_vm1, %v639_v62, %v590_v51 }
  0xa4   : > { %v1321_v38 = vperm.slane %v640_v15, %v1297_v8  ;;  %v1324_v39 = vperm.slane %v642_v10, %v1297_v8 }
  0xa5   : > { %v395_v53 = vpop.f32.mrf.mxu2  ;;  %v415_v54 = vpop.f32.mrf.mxu3  ;;  %v628_v9 = vsel %vm579_vm1, %v627_v56, %v586_v55  ;;  %v630_v23 = vsel %vm579_vm1, %v598_v50, %v629_v5 }
  0xa6   : > { %v603_v63 = vrot.slane %v395_v53, 4  ;;  %v615_v0 = vrot.slane %v415_v54, 4  ;;  %v606_v6 = vsel %vm579_vm1, %v395_v53, %v605_v57  ;;  %v618_v7 = vsel %vm579_vm1, %v415_v54, %v617_v58 }
  0xa7   : > { %v614_v20 = vperm.slane %v606_v6, %v1285_v43  ;;  %v626_v21 = vperm.slane %v618_v7, %v1285_v43  ;;  %v1309_v22 = vperm.slane %v628_v9, %v1297_v8  ;;  %v1327_v44 = vperm.slane %v630_v23, %v1297_v8 }
  0xa8   : > { %v604_v11 = vsel %vm579_vm1, %v603_v63, %v355_v45  ;;  %v616_v12 = vsel %vm579_vm1, %v615_v0, %v375_v46 }
  0xa9   : > { %v435_v1 = vpop.f32.mrf.mxu0  ;;  %v455_v2 = vpop.f32.mrf.mxu1  ;;  %v610_v24 = vperm.slane %v604_v11, %v1285_v43  ;;  %v622_v25 = vperm.slane %v616_v12, %v1285_v43  ;;  %v665_v41 = vrot.slane %v614_v20, 4  ;;  %v663_v45 = vrot.slane %v626_v21, 4 }
  0xaa   : > { %v693_v3 = vrot.slane %v435_v1, 4  ;;  %v705_v4 = vrot.slane %v455_v2, 4  ;;  %v677_v50 = vrot.slane %v1309_v22, 4 }
  0xab   : > { %v653_v40 = vrot.slane %v610_v24, 4  ;;  %v651_v42 = vrot.slane %v622_v25, 4  ;;  %v664_v10 = vsel %vm579_vm1, %v663_v45, %v614_v20  ;;  %v666_v11 = vsel %vm579_vm1, %v626_v21, %v665_v41 }
  0xad   : > { %v475_v13 = vpop.f32.mrf.mxu2  ;;  %v495_v14 = vpop.f32.mrf.mxu3  ;;  %v652_v61 = vsel %vm579_vm1, %v651_v42, %v610_v24  ;;  %v654_v62 = vsel %vm579_vm1, %v622_v25, %v653_v40  ;;  %v681_v24 = vrot.slane %v1327_v44, 4 }
  0xae   : > { %v691_v16 = vrot.slane %v475_v13, 4  ;;  %v694_v17 = vsel %vm579_vm1, %v475_v13, %v693_v3  ;;  %v703_v18 = vrot.slane %v495_v14, 4  ;;  %v706_v19 = vsel %vm579_vm1, %v495_v14, %v705_v4 }
  0xaf   : > { %v702_v29 = vperm.slane %v694_v17, %v1285_v43  ;;  %v714_v31 = vperm.slane %v706_v19, %v1285_v43  ;;  %v658_v13 = vperm.slane %v652_v61, %v1297_v8 }
  0xb0   : > { %v692_v26 = vsel %vm579_vm1, %v691_v16, %v435_v1  ;;  %v704_v27 = vsel %vm579_vm1, %v703_v18, %v455_v2 }
  0xb1   : > { %v698_v28 = vperm.slane %v692_v26, %v1285_v43  ;;  %v710_v30 = vperm.slane %v704_v27, %v1285_v43  ;;  %v515_v32 = vpop.f32.mrf.mxu0  ;;  %v535_v33 = vpop.f32.mrf.mxu1  ;;  %v753_v46 = vrot.slane %v702_v29, 4  ;;  %v751_v47 = vrot.slane %v714_v31, 4 }
  0xb2   : > { %v717_v34 = vrot.slane %v515_v32, 4  ;;  %v729_v35 = vrot.slane %v535_v33, 4  ;;  %v670_v27 = vperm.slane %v664_v10, %v1297_v8 }
  0xb3   : > { %v741_v36 = vrot.slane %v698_v28, 4  ;;  %v739_v37 = vrot.slane %v710_v30, 4  ;;  %v752_v3 = vsel %vm579_vm1, %v751_v47, %v702_v29  ;;  %v754_v4 = vsel %vm579_vm1, %v714_v31, %v753_v46 }
  0xb4   : > { %v762_v15 = vperm.slane %v754_v4, %v1297_v8  ;;  %v758_v18 = vperm.slane %v752_v3, %v1297_v8 }
  0xb5   : > { %v555_v48 = vpop.f32.mrf.mxu2  ;;  %v575_v49 = vpop.f32.mrf.mxu3  ;;  %v740_v57 = vsel %vm579_vm1, %v739_v37, %v698_v28  ;;  %v742_v58 = vsel %vm579_vm1, %v710_v30, %v741_v36 }
  0xb6   : > { %v715_v51 = vrot.slane %v555_v48, 4  ;;  %v718_v52 = vsel %vm579_vm1, %v555_v48, %v717_v34  ;;  %v727_v53 = vrot.slane %v575_v49, 4  ;;  %v730_v54 = vsel %vm579_vm1, %v575_v49, %v729_v35  ;;  %v803_v49 = vld [vmem:[%s208_s5] sm:$0xff] }
  0xb7   : > { %v726_v55 = vperm.slane %v718_v52, %v1285_v43  ;;  %v738_v56 = vperm.slane %v730_v54, %v1285_v43  ;;  %v746_v5 = vperm.slane %v740_v57, %v1297_v8  ;;  %v750_v6 = vperm.slane %v742_v58, %v1297_v8 }
  0xb8   : > { %v716_v59 = vsel %vm579_vm1, %v715_v51, %v515_v32  ;;  %v728_v60 = vsel %vm579_vm1, %v727_v53, %v535_v33  ;;  %v678_v32 = vsel %vm579_vm1, %v658_v13, %v677_v50  ;;  %v675_v33 = vrot.slane %v658_v13, 4 }
  0xb9   : > { %v722_v63 = vperm.slane %v716_v59, %v1285_v43  ;;  %v777_v0 = vrot.slane %v726_v55, 4  ;;  %v734_v1 = vperm.slane %v728_v60, %v1285_v43  ;;  %v775_v2 = vrot.slane %v738_v56, 4 }
  0xba   : > { %v662_v43 = vperm.slane %v654_v62, %v1297_v8  ;;  %v789_v20 = vrot.slane %v746_v5, 4  ;;  %v793_v23 = vrot.slane %v750_v6, 4  ;;  %v674_v35 = vperm.slane %v666_v11, %v1297_v8 }
  0xbb   : > { %v765_v7 = vrot.slane %v722_v63, 4  ;;  %v763_v9 = vrot.slane %v734_v1, 4  ;;  %v778_v12 = vsel %vm579_vm1, %v738_v56, %v777_v0  ;;  %v776_v14 = vsel %vm579_vm1, %v775_v2, %v726_v55 }
  0xbc   : > { %v782_v25 = vperm.slane %v776_v14, %v1297_v8  ;;  %v786_v26 = vperm.slane %v778_v12, %v1297_v8  ;;  %v679_v34 = vrot.slane %v662_v43, 4  ;;  %v797_v40 = vrot.slane %v758_v18, 4 }
  0xbd   : > { %v764_v16 = vsel %vm579_vm1, %v763_v9, %v722_v63  ;;  %v766_v17 = vsel %vm579_vm1, %v734_v1, %v765_v7  ;;  %v801_v41 = vrot.slane %v762_v15, 4  ;;  %v682_v42 = vsel %vm579_vm1, %v662_v43, %v681_v24 }
  0xbe   : > { %v770_v19 = vperm.slane %v764_v16, %v1297_v8  ;;  %v774_v21 = vperm.slane %v766_v17, %v1297_v8  ;;  %v795_v45 = vrot.slane %v782_v25, 4  ;;  %v799_v46 = vrot.slane %v786_v26, 4 }
  0xbf   : > { %v798_v47 = vsel %vm579_vm1, %v782_v25, %v797_v40  ;;  %v802_v48 = vsel %vm579_vm1, %v786_v26, %v801_v41  ;;  %v685_v8 = vrot.slane %v1321_v38, 4  ;;  %v676_v50 = vsel %vm579_vm1, %v675_v33, %v1309_v22 }
  0xc0   : > { %v790_v28 = vsel %vm579_vm1, %v770_v19, %v789_v20  ;;  %v794_v29 = vsel %vm579_vm1, %v774_v21, %v793_v23  ;;  %v787_v30 = vrot.slane %v770_v19, 4  ;;  %v791_v31 = vrot.slane %v774_v21, 4 }
  0xc1   : > { %841 = vmatpush.msra.mxu1 %v790_v28  ;;  %881 = vmatpush.msra.mxu3 %v794_v29  ;;  %v680_v51 = vsel %vm579_vm1, %v679_v34, %v1327_v44  ;;  %v683_v52 = vrot.slane %v670_v27, 4  ;;  %v686_v53 = vsel %vm579_vm1, %v670_v27, %v685_v8  ;;  %v689_v54 = vrot.slane %v1324_v39, 4 }
  0xc2   : > { %v788_v36 = vsel %vm579_vm1, %v787_v30, %v746_v5  ;;  %v792_v37 = vsel %vm579_vm1, %v791_v31, %v750_v6  ;;  %v687_v55 = vrot.slane %v674_v35, 4  ;;  %v796_v56 = vsel %vm579_vm1, %v795_v45, %v758_v18 }
  0xc3   : > { %821 = vmatpush.msra.mxu0 %v788_v36  ;;  %842 = vmatpush.msra.mxu1 %v678_v32  ;;  %v800_v57 = vsel %vm579_vm1, %v799_v46, %v762_v15  ;;  %v690_v22 = vsel %vm579_vm1, %v674_v35, %v689_v54  ;;  %v684_v44 = vsel %vm579_vm1, %v683_v52, %v1321_v38 }
  0xc4   : > { %861 = vmatpush.msra.mxu2 %v792_v37  ;;  %882 = vmatpush.msra.mxu3 %v682_v42  ;;  %v688_v58 = vsel %vm579_vm1, %v687_v55, %v1324_v39 }
  0xc5   : > { %921 = vmatpush.msrb.mxu1 %v798_v47  ;;  %822 = vmatpush.msra.mxu0 %v676_v50 }
  0xc6   : > { %961 = vmatpush.msrb.mxu3 %v802_v48  ;;  %862 = vmatpush.msra.mxu2 %v680_v51 }
  0xc7   : > { %1122 = vmatmul.msk.f32.vlgmr.msra.gmra.mxu0 %vm254_vm0, %v803_v49  ;;  %922 = vmatpush.msrb.mxu1 %v686_v53 }
  0xc8   : > { %901 = vmatpush.msrb.mxu0 %v796_v56  ;;  %941 = vmatpush.msrb.mxu2 %v800_v57 }
  0xc9   : > { %962 = vmatpush.msrb.mxu3 %v690_v22  ;;  %1124 = vmatmul.msk.f32.vlgmr.msra.gmra.mxu2 %vm254_vm0, %v803_v49 }
  0xca   : > { %1125 = vmatmul.msk.f32.vlgmr.msra.gmra.mxu3 %vm254_vm0, %v803_v49  ;;  %902 = vmatpush.msrb.mxu0 %v684_v44 }
  0xcb   : > { %942 = vmatpush.msrb.mxu2 %v688_v58  ;;  %1123 = vmatmul.msk.f32.vlgmr.msra.gmra.mxu1 %vm254_vm0, %v803_v49 }
  0xcf   : > { %1126 = vmatmul.msk.f32.vlgmr.msrb.gmra.mxu0 %vm254_vm0, %v803_v49 }
  0xd1   : > { %1128 = vmatmul.msk.f32.vlgmr.msrb.gmra.mxu2 %vm254_vm0, %v803_v49 }
  0xd2   : > { %1129 = vmatmul.msk.f32.vlgmr.msrb.gmra.mxu3 %vm254_vm0, %v803_v49 }
  0xd3   : > { %1127 = vmatmul.msk.f32.vlgmr.msrb.gmra.mxu1 %vm254_vm0, %v803_v49 }
 0x144   : > { %v824_v59 = vpop.f32.mrf.mxu0 }
 0x148   : > { %v844_v60 = vpop.f32.mrf.mxu1 }
 0x149   : > { %v967_v38 = vmax.f32 %v824_v59, %v844_v60 }
 0x14b   : > { %v969_v61 = vrot.slane %v967_v38, 1 }
 0x14c   : > { %v864_v62 = vpop.f32.mrf.mxu2  ;;  %v904_v63 = vpop.f32.mrf.mxu0 }
 0x14d   : > { %v972_v39 = vsel %vm971_vm2, %v969_v61, %v967_v38  ;;  %v974_v0 = vmax.f32 %v844_v60, %v864_v62  ;;  %v884_v1 = vpop.f32.mrf.mxu3 }
 0x14e   : > { %v973_v2 = vmax.f32 %v967_v38, %v972_v39  ;;  %v980_v3 = vmax.f32 %v864_v62, %v884_v1  ;;  %v986_v4 = vmax.f32 %v884_v1, %v904_v63 }
 0x14f   : > { %v976_v5 = vrot.slane %v974_v0, 1 }
 0x150   : > { %1010 = vst [vmem:[%s1402_s9] sm:$0xff] %v973_v2  ;;  %v982_v6 = vrot.slane %v980_v3, 1  ;;  %v988_v7 = vrot.slane %v986_v4, 1  ;;  %v924_v9 = vpop.f32.mrf.mxu1 }
 0x151   : > { %v978_v10 = vsel %vm971_vm2, %v976_v5, %v974_v0  ;;  %v992_v11 = vmax.f32 %v904_v63, %v924_v9 }
 0x152   : > { %v979_v12 = vmax.f32 %v974_v0, %v978_v10  ;;  %v984_v13 = vsel %vm971_vm2, %v982_v6, %v980_v3  ;;  %v990_v43 = vsel %vm971_vm2, %v988_v7, %v986_v4 }
 0x153   : > { %v985_v14 = vmax.f32 %v980_v3, %v984_v13  ;;  %v991_v15 = vmax.f32 %v986_v4, %v990_v43  ;;  %v994_v16 = vrot.slane %v992_v11, 1 }
 0x154   : > { %1011 = vst [vmem:[%s1402_s9 + $0x8] sm:$0xff] %v979_v12  ;;  %v944_v17 = vpop.f32.mrf.mxu2 }
 0x155   : > { %1012 = vst [vmem:[%s1402_s9 + $0x10] sm:$0xff] %v985_v14  ;;  %v996_v18 = vsel %vm971_vm2, %v994_v16, %v992_v11  ;;  %v998_v19 = vmax.f32 %v924_v9, %v944_v17  ;;  %v964_v20 = vpop.f32.mrf.mxu3 }
 0x156   : > { %1013 = vst [vmem:[%s1402_s9 + $0x18] sm:$0xff] %v991_v15  ;;  %v997_v21 = vmax.f32 %v992_v11, %v996_v18  ;;  %v1004_v23 = vmax.f32 %v944_v17, %v964_v20 }
 0x157   : > { %v1000_v24 = vrot.slane %v998_v19, 1 }
 0x158   : > { %1014 = vst [vmem:[%s1402_s9 + $0x20] sm:$0xff] %v997_v21  ;;  %v1006_v25 = vrot.slane %v1004_v23, 1 }
 0x159   : > { %v1002_v26 = vsel %vm971_vm2, %v1000_v24, %v998_v19 }
 0x15a   : > { %v1003_v27 = vmax.f32 %v998_v19, %v1002_v26  ;;  %v1008_v28 = vsel %vm971_vm2, %v1006_v25, %v1004_v23 }
 0x15b   : > { %v1009_v29 = vmax.f32 %v1004_v23, %v1008_v28 }
 0x15c   : > { %1015 = vst [vmem:[%s1402_s9 + $0x28] sm:$0xff] %v1003_v27 }
 0x15d   : > { %1016 = vst [vmem:[%s1402_s9 + $0x30] sm:$0xff] %v1009_v29 }
 0x15e PF: > { %s22_s19 = sadd.s32 1, %s1165_s19  }
 0x15f   : > { %p19_p5 = scmp.ge.s32.totalorder %s22_s19, 8  }
 0x161   :  { %21 = sbr.rel (!%p19_p5) target bundleno = 7 (0x7), region = 68 }

</bundles_post_ra>
